<compile_context>
chip_gen: v7x
topology: tpu7x:2x2x1
jax: 0.10.0
libtpu: 0.0.40
codegen_flags: <defaults>
</compile_context>

<pallas_src>
import jax
import jax.numpy as jnp
import numpy as np
from jax.experimental import pallas as pl
from jax.experimental.pallas import tpu as pltpu


def _make_kernel(n, block_b, chunk):
    """Builds the kernel for a (n, block_b) z^T tile, lane-chunked by `chunk`."""
    n_chunks = block_b // chunk

    def compute_chunk(zc, scale, wfT, w1T, b1, w2, inv_tau, b2):
        # ---------- NeuralSort soft permutation fused with f(P) ----------
        # bsum[i,b] = sum_j |z[b,i] - z[b,j]|, accumulated row-by-row:
        # no (n, n, C) absdiff temporary is ever materialized.
        bsum = jnp.abs(zc - zc[0:1, :])                               # (n, C)
        for j in range(1, n):
            bsum = bsum + jnp.abs(zc - zc[j:j + 1, :])                # (n, C)

        # logits[i, k, b] = (z[b,i]*scale[k] - bsum[i,b]) / tau
        logits = (zc[:, None, :] * scale - bsum[:, None, :]) * inv_tau  # (n,n,C)
        m = jnp.max(logits, axis=0, keepdims=True)                    # (1,n,C)
        e = jnp.exp(logits - m)                                       # (n,n,C) EUP
        den = jnp.sum(e, axis=0)                                      # (n,C)
        # num[k,b] = sum_i e[i,k,b] * Wf[k,i]  (Wf passed transposed as (n,n,1))
        num = jnp.sum(e * wfT, axis=0)                                # (n,C)

        # f(P)[b] = sum_k num[k,b] / den[k,b] -- P never materialized.
        # approx reciprocal on the (otherwise idle) EUP + 2 Newton steps on VPU.
        r = pl.reciprocal(den, approx=True)
        r = r * (2.0 - den * r)
        r = r * (2.0 - den * r)
        f_val = jnp.sum(num * r, axis=0, keepdims=True)               # (1,C)

        # ---------- rho(z): Linear -> ReLU -> Linear ----------
        h = jnp.maximum(
            jnp.dot(w1T, zc, preferred_element_type=jnp.float32) + b1, 0.0)  # (H,C)
        # out_features == 1: broadcast-multiply + reduce instead of a 1-lane matmul.
        rho = jnp.sum(h * w2, axis=0, keepdims=True) + b2             # (1,C)
        return f_val + rho

    def kernel(invtau_ref, b2_ref, zT_ref, wfT_ref, w1T_ref, b1_ref, w2_ref,
               o_ref):
        inv_tau = invtau_ref[0]            # scalar 1/tau (hoisted exp in wrapper)
        b2 = b2_ref[0]
        wfT = wfT_ref[...]                 # (n, n, 1), resident (constant index_map)
        w1T = w1T_ref[...]                 # (H, n)
        b1 = b1_ref[...]                   # (H, 1)
        w2 = w2_ref[...]                   # (H, 1)

        # scale[k] = n + 1 - 2*(k+1) = (n-1) - 2k, generated once per grid step.
        k_idx = jax.lax.broadcasted_iota(jnp.int32, (1, n, 1), 1).astype(jnp.float32)
        scale = (n - 1) - 2.0 * k_idx                                 # (1, n, 1)

        if n_chunks == 1:
            o_ref[...] = compute_chunk(zT_ref[...], scale, wfT, w1T, b1, w2,
                                       inv_tau, b2)
        else:
            # Lane-axis chunking bounds vreg live ranges (~24 live vregs/chunk).
            @pl.loop(0, n_chunks)
            def _(c):
                start = pl.multiple_of(c * chunk, 128)
                zc = zT_ref[:, pl.ds(start, chunk)]
                o_ref[:, pl.ds(start, chunk)] = compute_chunk(
                    zc, scale, wfT, w1T, b1, w2, inv_tau, b2)

    return kernel


def _pick_batch_tile(B, n):
    """Largest batch tile (multiple of 128 dividing B) under a conservative
    per-step VMEM budget.  With the lane-chunked kernel the per-step footprint
    is only the double-buffered z^T / out blocks (weights are resident), so the
    cap is high (8192).  Prefers a grid of length >= 2 when the batch allows it
    so both v7x TensorCores get work.  Falls back to one full-batch tile."""
    budget = 16 * 1024 * 1024
    cap = 8192
    while cap > 128 and 2 * (n + 1) * cap * 4 > budget:
        cap //= 2
    if B >= 256:
        cap = min(cap, max(128, ((B // 2) // 128) * 128))   # >= 2 grid steps
    best = None
    t = 128
    while t <= min(cap, B):
        if B % t == 0:
            best = t
        t += 128
    return best if best is not None else B


def _pick_chunk(block_b):
    if block_b % 256 == 0:
        return 256
    if block_b % 128 == 0:
        return 128
    return block_b


def relax_critic(log_tau, z, Wf, W1, b1, W2, b2, *, block_b=None):
    B, d = z.shape
    H = W1.shape[1]
    if block_b is None:
        block_b = _pick_batch_tile(B, d)
    if not (block_b == B or (block_b % 128 == 0 and B % block_b == 0)):
        raise ValueError(
            "block_b must equal the batch size or be a multiple of 128 dividing it")
    chunk = _pick_chunk(block_b)

    # Layout plumbing in the wrapper: batch goes on the lane axis inside the kernel.
    zT = jnp.transpose(z).astype(jnp.float32)                # (d, B)
    WfT3 = jnp.transpose(Wf)[:, :, None].astype(jnp.float32) # (d, d, 1) indexed [i, k]
    W1T = jnp.transpose(W1).astype(jnp.float32)              # (H, d)
    b1c = jnp.reshape(b1, (H, 1)).astype(jnp.float32)        # (H, 1)
    W2c = jnp.reshape(W2, (H, 1)).astype(jnp.float32)        # (H, 1)
    b2s = jnp.reshape(b2, (1,)).astype(jnp.float32)          # (1,)
    # Hoisted: one exp total instead of one per grid step.
    inv_tau = jnp.exp(-jnp.reshape(log_tau, (1,)).astype(jnp.float32))  # (1,)

    grid = (B // block_b,)
    kernel = _make_kernel(d, block_b, chunk)
    out = pl.pallas_call(
        kernel,
        out_shape=jax.ShapeDtypeStruct((1, B), jnp.float32),
        grid=grid,
        in_specs=[
            pl.BlockSpec(memory_space=pltpu.MemorySpace.SMEM),        # 1/tau  (1,)
            pl.BlockSpec(memory_space=pltpu.MemorySpace.SMEM),        # b2     (1,)
            pl.BlockSpec((d, block_b), lambda i: (0, i)),             # z^T    (d, B)
            pl.BlockSpec((d, d, 1), lambda i: (0, 0, 0)),             # Wf^T   (d, d, 1)
            pl.BlockSpec((H, d), lambda i: (0, 0)),                   # W1^T   (H, d)
            pl.BlockSpec((H, 1), lambda i: (0, 0)),                   # b1     (H, 1)
            pl.BlockSpec((H, 1), lambda i: (0, 0)),                   # W2     (H, 1)
        ],
        out_specs=pl.BlockSpec((1, block_b), lambda i: (0, i)),       # lane-dense out
        compiler_params=pltpu.CompilerParams(
            dimension_semantics=("parallel",),      # megacore on v7x; no-op v5e/v6e
            vmem_limit_bytes=32 * 1024 * 1024,      # above v5e's 16 MiB default
        ),
    )(inv_tau, b2s, zT, WfT3, W1T, b1c, W2c)
    return jnp.reshape(out, (B, 1))


def relax_critic_ref(log_tau, z, Wf, W1, b1, W2, b2):
    """Pure-JAX reference (mirrors the PyTorch forward)."""
    n = z.shape[1]
    tau = jnp.exp(log_tau[0])
    scale = (n + 1 - 2 * jnp.arange(1, n + 1)).astype(jnp.float32)
    absdiff = jnp.abs(z[:, :, None] - z[:, None, :])
    bsum = jnp.sum(absdiff, axis=2)
    pmax = z[:, None, :] * scale[None, :, None] - bsum[:, None, :]
    P = jax.nn.softmax(pmax / tau, axis=-1)
    f_val = jnp.sum(P * Wf[None, :, :], axis=(1, 2))[:, None]
    h = jnp.maximum(z @ W1 + b1[None, :], 0.0)
    rho = h @ W2 + b2[None, :]
    return f_val + rho


if __name__ == "__main__":
    d, H = 8, 32   # feature dim (n items to sort), rho hidden dim
    key = jax.random.PRNGKey(0)
    kz, kf, k1, kb1, k2, kb2, kz2, kz3 = jax.random.split(key, 8)

    # module parameters (deterministic synthetic init)
    log_tau = jnp.zeros((1,), dtype=jnp.float32)                   # nn.Parameter(zeros(1))
    Wf = 0.1 * jax.random.normal(kf, (d, d), dtype=jnp.float32)    # synthetic linear f
    W1 = 0.1 * jax.random.normal(k1, (d, H), dtype=jnp.float32)    # Linear(d, H)
    b1 = 0.1 * jax.random.normal(kb1, (H,), dtype=jnp.float32)
    W2 = 0.1 * jax.random.normal(k2, (H, 1), dtype=jnp.float32)    # Linear(H, 1)
    b2 = 0.1 * jax.random.normal(kb2, (1,), dtype=jnp.float32)

    # --- small batch: single grid step, single chunk (block == full batch) ---
    B = 2
    z = jax.random.normal(kz, (B, d), dtype=jnp.float32)
    out = jax.block_until_ready(relax_critic(log_tau, z, Wf, W1, b1, W2, b2))
    ref = relax_critic_ref(log_tau, z, Wf, W1, b1, W2, b2)
    np.testing.assert_allclose(np.asarray(out), np.asarray(ref), rtol=1e-5, atol=1e-5)
    assert out.shape == (B, 1)

    # --- medium batch, explicit tile: grid=(2,), one 128-lane chunk per step ---
    B2 = 256
    z2 = jax.random.normal(kz2, (B2, d), dtype=jnp.float32)
    out2 = jax.block_until_ready(
        relax_critic(log_tau, z2, Wf, W1, b1, W2, b2, block_b=128))
    ref2 = relax_critic_ref(log_tau, z2, Wf, W1, b1, W2, b2)
    np.testing.assert_allclose(np.asarray(out2), np.asarray(ref2), rtol=1e-5, atol=1e-5)
    assert out2.shape == (B2, 1)

    # --- larger batch, auto tile: grid=(2,) with in-kernel lane chunking (pl.loop) ---
    B3 = 1024
    z3 = jax.random.normal(kz3, (B3, d), dtype=jnp.float32)
    out3 = jax.block_until_ready(relax_critic(log_tau, z3, Wf, W1, b1, W2, b2))
    ref3 = relax_critic_ref(log_tau, z3, Wf, W1, b1, W2, b2)
    np.testing.assert_allclose(np.asarray(out3), np.asarray(ref3), rtol=1e-5, atol=1e-5)
    assert out3.shape == (B3, 1)

    print("KERNEL_OK")
</pallas_src>

<mosaic_0001>
module attributes {stable_mosaic.version = 11 : i64} {
  func.func @kernel(%arg0: i32, %arg1: memref<1xf32, #tpu.memory_space<smem>>, %arg2: memref<1xf32, #tpu.memory_space<smem>>, %arg3: memref<8x2xf32, #tpu.memory_space<vmem>>, %arg4: memref<8x8x1xf32, #tpu.memory_space<vmem>>, %arg5: memref<32x8xf32, #tpu.memory_space<vmem>>, %arg6: memref<32x1xf32, #tpu.memory_space<vmem>>, %arg7: memref<32x1xf32, #tpu.memory_space<vmem>>, %arg8: memref<1x2xf32, #tpu.memory_space<vmem>>) attributes {dimension_semantics = [#tpu.dimension_semantics<parallel>], iteration_bounds = array<i64: 1>, scalar_prefetch = 0 : i64, scratch_operands = 0 : i64, tpu.core_type = #tpu.core_type<tc>, window_params = [{transform_indices = @transform_0, window_bounds = array<i64: 1>}, {transform_indices = @transform_1, window_bounds = array<i64: 1>}, {transform_indices = @transform_2, window_bounds = array<i64: 8, 2>}, {pipeline_mode = #tpu.pipeline_mode<synchronous>, transform_indices = @transform_3, window_bounds = array<i64: 8, 8, 1>}, {pipeline_mode = #tpu.pipeline_mode<synchronous>, transform_indices = @transform_4, window_bounds = array<i64: 32, 8>}, {pipeline_mode = #tpu.pipeline_mode<synchronous>, transform_indices = @transform_5, window_bounds = array<i64: 32, 1>}, {pipeline_mode = #tpu.pipeline_mode<synchronous>, transform_indices = @transform_6, window_bounds = array<i64: 32, 1>}, {transform_indices = @transform_7, window_bounds = array<i64: 1, 2>}]} {
    %c0 = arith.constant 0 : index
    %0 = memref.load %arg1[%c0] : memref<1xf32, #tpu.memory_space<smem>>
    %c0_0 = arith.constant 0 : index
    %1 = memref.load %arg2[%c0_0] : memref<1xf32, #tpu.memory_space<smem>>
    %c0_1 = arith.constant 0 : index
    %c0_2 = arith.constant 0 : index
    %c0_3 = arith.constant 0 : index
    %2 = vector.load %arg4[%c0_1, %c0_2, %c0_3] : memref<8x8x1xf32, #tpu.memory_space<vmem>>, vector<8x8x1xf32>
    %c0_4 = arith.constant 0 : index
    %c0_5 = arith.constant 0 : index
    %3 = vector.load %arg5[%c0_4, %c0_5] : memref<32x8xf32, #tpu.memory_space<vmem>>, vector<32x8xf32>
    %c0_6 = arith.constant 0 : index
    %c0_7 = arith.constant 0 : index
    %4 = vector.load %arg6[%c0_6, %c0_7] : memref<32x1xf32, #tpu.memory_space<vmem>>, vector<32x1xf32>
    %c0_8 = arith.constant 0 : index
    %c0_9 = arith.constant 0 : index
    %5 = vector.load %arg7[%c0_8, %c0_9] : memref<32x1xf32, #tpu.memory_space<vmem>>, vector<32x1xf32>
    %6 = tpu.iota {dimensions = array<i32: 1>} : vector<1x8x1xi32>
    %7 = arith.sitofp %6 : vector<1x8x1xi32> to vector<1x8x1xf32>
    %cst = arith.constant 2.000000e+00 : f32
    %8 = vector.broadcast %cst : f32 to vector<1x8x1xf32>
    %9 = arith.mulf %8, %7 : vector<1x8x1xf32>
    %cst_10 = arith.constant 7.000000e+00 : f32
    %10 = vector.broadcast %cst_10 : f32 to vector<1x8x1xf32>
    %11 = arith.subf %10, %9 : vector<1x8x1xf32>
    %c0_11 = arith.constant 0 : index
    %c0_12 = arith.constant 0 : index
    %12 = vector.load %arg3[%c0_11, %c0_12] : memref<8x2xf32, #tpu.memory_space<vmem>>, vector<8x2xf32>
    %13 = vector.extract_strided_slice %12 {offsets = [0, 0], sizes = [1, 2], strides = [1, 1]} : vector<8x2xf32> to vector<1x2xf32>
    %14 = vector.broadcast %13 : vector<1x2xf32> to vector<8x2xf32>
    %15 = arith.subf %12, %14 : vector<8x2xf32>
    %16 = math.absf %15 : vector<8x2xf32>
    %17 = vector.extract_strided_slice %12 {offsets = [1, 0], sizes = [1, 2], strides = [1, 1]} : vector<8x2xf32> to vector<1x2xf32>
    %18 = vector.broadcast %17 : vector<1x2xf32> to vector<8x2xf32>
    %19 = arith.subf %12, %18 : vector<8x2xf32>
    %20 = math.absf %19 : vector<8x2xf32>
    %21 = arith.addf %16, %20 : vector<8x2xf32>
    %22 = vector.extract_strided_slice %12 {offsets = [2, 0], sizes = [1, 2], strides = [1, 1]} : vector<8x2xf32> to vector<1x2xf32>
    %23 = vector.broadcast %22 : vector<1x2xf32> to vector<8x2xf32>
    %24 = arith.subf %12, %23 : vector<8x2xf32>
    %25 = math.absf %24 : vector<8x2xf32>
    %26 = arith.addf %21, %25 : vector<8x2xf32>
    %27 = vector.extract_strided_slice %12 {offsets = [3, 0], sizes = [1, 2], strides = [1, 1]} : vector<8x2xf32> to vector<1x2xf32>
    %28 = vector.broadcast %27 : vector<1x2xf32> to vector<8x2xf32>
    %29 = arith.subf %12, %28 : vector<8x2xf32>
    %30 = math.absf %29 : vector<8x2xf32>
    %31 = arith.addf %26, %30 : vector<8x2xf32>
    %32 = vector.extract_strided_slice %12 {offsets = [4, 0], sizes = [1, 2], strides = [1, 1]} : vector<8x2xf32> to vector<1x2xf32>
    %33 = vector.broadcast %32 : vector<1x2xf32> to vector<8x2xf32>
    %34 = arith.subf %12, %33 : vector<8x2xf32>
    %35 = math.absf %34 : vector<8x2xf32>
    %36 = arith.addf %31, %35 : vector<8x2xf32>
    %37 = vector.extract_strided_slice %12 {offsets = [5, 0], sizes = [1, 2], strides = [1, 1]} : vector<8x2xf32> to vector<1x2xf32>
    %38 = vector.broadcast %37 : vector<1x2xf32> to vector<8x2xf32>
    %39 = arith.subf %12, %38 : vector<8x2xf32>
    %40 = math.absf %39 : vector<8x2xf32>
    %41 = arith.addf %36, %40 : vector<8x2xf32>
    %42 = vector.extract_strided_slice %12 {offsets = [6, 0], sizes = [1, 2], strides = [1, 1]} : vector<8x2xf32> to vector<1x2xf32>
    %43 = vector.broadcast %42 : vector<1x2xf32> to vector<8x2xf32>
    %44 = arith.subf %12, %43 : vector<8x2xf32>
    %45 = math.absf %44 : vector<8x2xf32>
    %46 = arith.addf %41, %45 : vector<8x2xf32>
    %47 = vector.extract_strided_slice %12 {offsets = [7, 0], sizes = [1, 2], strides = [1, 1]} : vector<8x2xf32> to vector<1x2xf32>
    %48 = vector.broadcast %47 : vector<1x2xf32> to vector<8x2xf32>
    %49 = arith.subf %12, %48 : vector<8x2xf32>
    %50 = math.absf %49 : vector<8x2xf32>
    %51 = arith.addf %46, %50 : vector<8x2xf32>
    %52 = vector.shape_cast %12 : vector<8x2xf32> to vector<8x1x2xf32>
    %53 = vector.broadcast %52 : vector<8x1x2xf32> to vector<8x8x2xf32>
    %54 = vector.broadcast %11 : vector<1x8x1xf32> to vector<8x8x2xf32>
    %55 = arith.mulf %53, %54 : vector<8x8x2xf32>
    %56 = vector.shape_cast %51 : vector<8x2xf32> to vector<8x1x2xf32>
    %57 = vector.broadcast %56 : vector<8x1x2xf32> to vector<8x8x2xf32>
    %58 = arith.subf %55, %57 : vector<8x8x2xf32>
    %59 = vector.broadcast %0 : f32 to vector<8x8x2xf32>
    %60 = arith.mulf %58, %59 : vector<8x8x2xf32>
    %cst_13 = arith.constant dense<0xFF800000> : vector<8x2xf32>
    %61 = vector.multi_reduction <maximumf>, %60, %cst_13 [0] : vector<8x8x2xf32> to vector<8x2xf32>
    %62 = vector.shape_cast %61 : vector<8x2xf32> to vector<1x8x2xf32>
    %63 = vector.broadcast %62 : vector<1x8x2xf32> to vector<8x8x2xf32>
    %64 = arith.subf %60, %63 : vector<8x8x2xf32>
    %65 = math.exp %64 : vector<8x8x2xf32>
    %cst_14 = arith.constant dense<0.000000e+00> : vector<8x2xf32>
    %66 = vector.multi_reduction <add>, %65, %cst_14 [0] : vector<8x8x2xf32> to vector<8x2xf32>
    %67 = vector.broadcast %2 : vector<8x8x1xf32> to vector<8x8x2xf32>
    %68 = arith.mulf %65, %67 : vector<8x8x2xf32>
    %cst_15 = arith.constant dense<0.000000e+00> : vector<8x2xf32>
    %69 = vector.multi_reduction <add>, %68, %cst_15 [0] : vector<8x8x2xf32> to vector<8x2xf32>
    %70 = tpu.reciprocal %66 {approx = true} : vector<8x2xf32> -> vector<8x2xf32>
    %71 = arith.mulf %66, %70 : vector<8x2xf32>
    %cst_16 = arith.constant 2.000000e+00 : f32
    %72 = vector.broadcast %cst_16 : f32 to vector<8x2xf32>
    %73 = arith.subf %72, %71 : vector<8x2xf32>
    %74 = arith.mulf %70, %73 : vector<8x2xf32>
    %75 = arith.mulf %66, %74 : vector<8x2xf32>
    %cst_17 = arith.constant 2.000000e+00 : f32
    %76 = vector.broadcast %cst_17 : f32 to vector<8x2xf32>
    %77 = arith.subf %76, %75 : vector<8x2xf32>
    %78 = arith.mulf %74, %77 : vector<8x2xf32>
    %79 = arith.mulf %69, %78 : vector<8x2xf32>
    %cst_18 = arith.constant dense<0.000000e+00> : vector<2xf32>
    %80 = vector.multi_reduction <add>, %79, %cst_18 [0] : vector<8x2xf32> to vector<2xf32>
    %81 = vector.shape_cast %80 : vector<2xf32> to vector<1x2xf32>
    %cst_19 = arith.constant dense<0.000000e+00> : vector<32x2xf32>
    %82 = tpu.matmul %3, %12, %cst_19 {dimension_numbers = #tpu.dot_dimension_numbers<[1], [0], [0], [1], [0, 0, 1, 1], [], []>} : vector<32x8xf32>, vector<8x2xf32>, vector<32x2xf32> -> vector<32x2xf32>
    %83 = vector.broadcast %4 : vector<32x1xf32> to vector<32x2xf32>
    %84 = arith.addf %82, %83 : vector<32x2xf32>
    %cst_20 = arith.constant 0.000000e+00 : f32
    %85 = vector.broadcast %cst_20 : f32 to vector<32x2xf32>
    %86 = arith.maximumf %84, %85 : vector<32x2xf32>
    %87 = vector.broadcast %5 : vector<32x1xf32> to vector<32x2xf32>
    %88 = arith.mulf %86, %87 : vector<32x2xf32>
    %cst_21 = arith.constant dense<0.000000e+00> : vector<2xf32>
    %89 = vector.multi_reduction <add>, %88, %cst_21 [0] : vector<32x2xf32> to vector<2xf32>
    %90 = vector.shape_cast %89 : vector<2xf32> to vector<1x2xf32>
    %91 = vector.broadcast %1 : f32 to vector<1x2xf32>
    %92 = arith.addf %90, %91 : vector<1x2xf32>
    %93 = arith.addf %81, %92 : vector<1x2xf32>
    %c0_22 = arith.constant 0 : index
    %c0_23 = arith.constant 0 : index
    %94 = vector.load %arg8[%c0_22, %c0_23] : memref<1x2xf32, #tpu.memory_space<vmem>>, vector<1x2xf32>
    tpu.vector_store %arg8[%c0_22, %c0_23], %93 {strides = array<i32>} : memref<1x2xf32, #tpu.memory_space<vmem>>, vector<1x2xf32>,
    return
  }
  func.func @transform_0(%arg0: i32) -> i32 {
    %c0_i32 = arith.constant 0 : i32
    %c0_i32_0 = arith.constant 0 : i32
    return %c0_i32 : i32
  }
  func.func @transform_1(%arg0: i32) -> i32 {
    %c0_i32 = arith.constant 0 : i32
    %c0_i32_0 = arith.constant 0 : i32
    return %c0_i32 : i32
  }
  func.func @transform_2(%arg0: i32) -> (i32, i32) {
    %c0_i32 = arith.constant 0 : i32
    %c0_i32_0 = arith.constant 0 : i32
    return %c0_i32, %arg0 : i32, i32
  }
  func.func @transform_3(%arg0: i32) -> (i32, i32, i32) {
    %c0_i32 = arith.constant 0 : i32
    %c0_i32_0 = arith.constant 0 : i32
    %c0_i32_1 = arith.constant 0 : i32
    %c0_i32_2 = arith.constant 0 : i32
    return %c0_i32, %c0_i32_0, %c0_i32_1 : i32, i32, i32
  }
  func.func @transform_4(%arg0: i32) -> (i32, i32) {
    %c0_i32 = arith.constant 0 : i32
    %c0_i32_0 = arith.constant 0 : i32
    %c0_i32_1 = arith.constant 0 : i32
    return %c0_i32, %c0_i32_0 : i32, i32
  }
  func.func @transform_5(%arg0: i32) -> (i32, i32) {
    %c0_i32 = arith.constant 0 : i32
    %c0_i32_0 = arith.constant 0 : i32
    %c0_i32_1 = arith.constant 0 : i32
    return %c0_i32, %c0_i32_0 : i32, i32
  }
  func.func @transform_6(%arg0: i32) -> (i32, i32) {
    %c0_i32 = arith.constant 0 : i32
    %c0_i32_0 = arith.constant 0 : i32
    %c0_i32_1 = arith.constant 0 : i32
    return %c0_i32, %c0_i32_0 : i32, i32
  }
  func.func @transform_7(%arg0: i32) -> (i32, i32) {
    %c0_i32 = arith.constant 0 : i32
    %c0_i32_0 = arith.constant 0 : i32
    return %c0_i32, %arg0 : i32, i32
  }
}

</mosaic_0001>

<bundles_post_ra>
// kernel: tpu_custom_call.1
= control target key start
LH: loop header
LB: loop body
LE: loop exit
PB: predicated region body
PF: predicated region fallthrough
CT: control target
= control target key end

     0   :  { %vm470_vm0 = vcmask 64512   ;;  %v695_v7 = vmov 0   ;;  %s892_s0 = inlined_call_operand.<no memory space> [shape: f32[1], index: 0, kind: input, shape index: {}]   ;;  %s893_s1 = inlined_call_operand.<no memory space> [shape: f32[1], index: 1, kind: input, shape index: {}]   ;;  %s894_s2 = inlined_call_operand.vmem [shape: f32[8,2], index: 2, kind: input, shape index: {}]   ;;  %s895_s3 = inlined_call_operand.vmem [shape: f32[8,8,1], index: 3, kind: input, shape index: {}]   ;;  %s896_s4 = inlined_call_operand.vmem [shape: f32[32,8], index: 4, kind: input, shape index: {}]   ;;  %s897_s5 = inlined_call_operand.vmem [shape: f32[32,1], index: 5, kind: input, shape index: {}]   ;;  %s898_s6 = inlined_call_operand.vmem [shape: f32[32,1], index: 6, kind: input, shape index: {}]   ;;  %s899_s7 = inlined_call_operand.hbm [shape: f32[1,2], index: 7, kind: output, shape index: {}]  }
   0x1   :  { %v741_v0 = vld [vmem:[%s894_s2] sm:$0xff]  ;;  %v41_v2 = vld [vmem:[%s896_s4 + $0x10] sm:$0xff]  ;;  %v40_v3 = vld [vmem:[%s896_s4 + $0x8] sm:$0xff]  ;;  %650 = vset.pattern.permute.xlu0 %v695_v7  ;;  %651 = vset.pattern.permute.xlu1 %v695_v7 }
   0x2   :  { %v39_v1 = vld [vmem:[%s896_s4] sm:$0xff]  ;;  %637 = vmatprep.subr.mxu0 %v741_v0  ;;  %645 = vmatprep.subr.mxu1 %v741_v0  ;;  %v42_v4 = vld [vmem:[%s896_s4 + $0x18] sm:$0xff]  ;;  %v33_v6 = vld [vmem:[%s895_s3 + $0x10] sm:$0xff] }
   0x3   :  { %638 = vmatpush3.msra.mxu0 %v741_v0  ;;  %646 = vmatpush3.msra.mxu1 %v741_v0  ;;  %v31_v5 = vld [vmem:[%s895_s3] sm:$0xff]  ;;  %v32_v8 = vld [vmem:[%s895_s3 + $0x8] sm:$0xff]  ;;  %v34_v9 = vld [vmem:[%s895_s3 + $0x18] sm:$0xff] }
   0x4   :  { %639 = vmatprep.mubr.msk.f32.mxu0 %vm470_vm0, %v39_v1  ;;  %642 = vmatprep.mubr.msk.f32.mxu1 %vm470_vm0, %v41_v2 }
   0x5   :  { %640 = vmatmul.mubr.msk.f32.vlgmr.msra.gmra.mrb[0].mxu0 %vm470_vm0, %v40_v3  ;;  %643 = vmatmul.mubr.msk.f32.vlgmr.msra.gmra.mrb[0].mxu1 %vm470_vm0, %v42_v4 }
   0x6   :  { %374 = vperm.xlu0 %650, %v31_v5   ;;  %384 = vperm.xlu1 %651, %v33_v6  }
   0x7   :  { %14 = vsyncpa [#allocation5], 0  ;;  %v43_v10 = vld [vmem:[%s897_s5] sm:$0xff]  ;;  %v44_v11 = vld [vmem:[%s897_s5 + $0x8] sm:$0xff]  ;;  %v51_v18 = vlaneseq  ;;  %v696_v57 = vmov 1966171168   ;;  %v113_v2 = vcombine.high %v741_v0, %v741_v0 }
   0x8   :  { %v35_v12 = vld [vmem:[%s895_s3 + $0x20] sm:$0xff]  ;;  %v45_v13 = vld [vmem:[%s897_s5 + $0x10] sm:$0xff]  ;;  %v36_v14 = vld [vmem:[%s895_s3 + $0x28] sm:$0xff]  ;;  %v115_v58 = vunpack.c.l.s4 %v696_v57  ;;  %v308_v57 = vstv %s892_s0  ;;  %vm317_vm1 = vcmask 15360   ;;  %s697_s16 = smov [#allocation4]   ;;  %vm612_vm2 = vcmask 8192  }
   0x9   :  { %v46_v15 = vld [vmem:[%s897_s5 + $0x18] sm:$0xff]  ;;  %v47_v16 = vld [vmem:[%s898_s6] sm:$0xff]  ;;  %v48_v17 = vld [vmem:[%s898_s6 + $0x8] sm:$0xff]  ;;  %v52_v21 = vshrl.u32 %v51_v18, 7  ;;  %s620_s17 = sshll.u32 %s697_s16, 4  ;;  %s621_s17 = int_to_ptr.vmem [resolvable:$true] %s620_s17 }
   0xa   :  { %379 = vperm.xlu0 %650, %v32_v8   ;;  %389 = vperm.xlu1 %651, %v34_v9   ;;  %v37_v19 = vld [vmem:[%s895_s3 + $0x30] sm:$0xff]  ;;  %v38_v22 = vld [vmem:[%s895_s3 + $0x38] sm:$0xff]  ;;  %v116_v62 = vunpack.c.0.s8 %v115_v58  ;;  %s671_s18 = scalar_lea.vmem %s621_s17, 16  ;;  %s675_s19 = scalar_lea.vmem %s621_s17, 32 }
   0xb   :  { %v49_v20 = vld [vmem:[%s898_s6 + $0x10] sm:$0xff]  ;;  %v50_v23 = vld [vmem:[%s898_s6 + $0x18] sm:$0xff]  ;;  %v807_v24 = vsub.s32 0, %v52_v21  ;;  %v65_v25 = vsub.s32 1, %v52_v21  ;;  %v72_v28 = vsub.s32 2, %v52_v21  ;;  %v79_v32 = vsub.s32 3, %v52_v21  ;;  %p672_p0 = scmp.ne.s32.totalorder %s621_s17, %s671_s18  ;;  %p676_p1 = scmp.lt.s32.totalorder %s621_s17, %s621_s17 }
   0xc   :  { %v86_v33 = vsub.s32 4, %v52_v21  ;;  %v93_v38 = vsub.s32 5, %v52_v21  ;;  %v100_v47 = vsub.s32 6, %v52_v21  ;;  %v107_v52 = vsub.s32 7, %v52_v21  ;;  %p677_p2 = scmp.lt.s32.totalorder %s675_s19, %s671_s18 }
   0xd   :  { %v60_v26 = vrot.slane %v741_v0, %v807_v24  ;;  %v66_v27 = vrot.slane %v741_v0, %v65_v25  ;;  %v73_v31 = vrot.slane %v741_v0, %v72_v28  ;;  %v80_v37 = vrot.slane %v741_v0, %v79_v32 }
   0xe   :  { %452 = vperm.xlu0 %650, %v43_v10   ;;  %457 = vperm.xlu1 %651, %v44_v11   ;;  %v87_v42 = vrot.slane %v741_v0, %v86_v33  ;;  %v94_v43 = vrot.slane %v741_v0, %v93_v38  ;;  %v101_v51 = vrot.slane %v741_v0, %v100_v47  ;;  %v53_v10 = vcvt.s32.f32 %v52_v21  ;;  %p678_p3 = por %p677_p2, %p676_p1 }
   0xf   :  { %v61_v29 = vsub.f32 %v741_v0, %v60_v26  ;;  %v67_v30 = vsub.f32 %v741_v0, %v66_v27  ;;  %v74_v36 = vsub.f32 %v741_v0, %v73_v31  ;;  %v81_v41 = vsub.f32 %v741_v0, %v80_v37 }
  0x10   :  { %v88_v46 = vsub.f32 %v741_v0, %v87_v42  ;;  %v95_v48 = vsub.f32 %v741_v0, %v94_v43  ;;  %v102_v55 = vsub.f32 %v741_v0, %v101_v51  ;;  %v108_v56 = vrot.slane %v741_v0, %v107_v52  ;;  %p679_p4 = pnand %p678_p3, %p672_p0 }
  0x11   :  { %v62_v34 = vand.u32 2147483647, %v61_v29  ;;  %v68_v35 = vand.u32 2147483647, %v67_v30  ;;  %v75_v40 = vand.u32 2147483647, %v74_v36  ;;  %v119_v3 = vsub.s32 %v116_v62, %v52_v21 }
  0x12   :  { %394 = vperm.xlu0 %650, %v35_v12   ;;  %462 = vperm.xlu1 %651, %v45_v13   ;;  %v82_v45 = vand.u32 2147483647, %v81_v41  ;;  %v89_v50 = vand.u32 2147483647, %v88_v46  ;;  %v96_v54 = vand.u32 2147483647, %v95_v48  ;;  %v109_v61 = vsub.f32 %v741_v0, %v108_v56 }
  0x13   :  { %v69_v39 = vadd.f32 %v68_v35, %v62_v34  ;;  %v103_v60 = vand.u32 2147483647, %v102_v55  ;;  %v120_v5 = vrot.slane %v741_v0, %v119_v3  ;;  %v127_v6 = vrot.slane %v113_v2, %v119_v3 }
  0x14   :  { %v110_v1 = vand.u32 2147483647, %v109_v61 }
  0x15   :  { %v76_v44 = vadd.f32 %v75_v40, %v69_v39  ;;  %v128_v8 = vcombine.high %v120_v5, %v120_v5  ;;  %v129_v9 = vcombine.high %v127_v6, %v127_v6  ;;  %v136_v13 = vrot.slane %v120_v5, %v119_v3 }
  0x16   :  { %399 = vperm.xlu0 %650, %v36_v14   ;;  %467 = vperm.xlu1 %651, %v46_v15   ;;  %v143_v14 = vrot.slane %v127_v6, %v119_v3 }
  0x17   :  { %v83_v49 = vadd.f32 %v82_v45, %v76_v44  ;;  %v150_v15 = vrot.slane %v128_v8, %v119_v3  ;;  %v165_v21 = vrot.slane %v136_v13, %v807_v24 }
  0x18   :  { %v181_v32 = vrot.slane %v143_v14, %v807_v24 }
  0x19   :  { %v90_v53 = vadd.f32 %v89_v50, %v83_v49  ;;  %v169_v30 = vrot.slane %v150_v15, %v807_v24 }
  0x1a   :  { %574 = vperm.xlu0 %650, %v47_v16   ;;  %579 = vperm.xlu1 %651, %v48_v17   ;;  %v157_v16 = vrot.slane %v129_v9, %v119_v3  ;;  %v54_v17 = vmul.f32 2.0, %v53_v10 }
  0x1b   :  { %v97_v59 = vadd.f32 %v96_v54, %v90_v53 }
  0x1c   :  { %v161_v25 = vcombine.high %v157_v16, %v157_v16  ;;  %v55_v0 = vsub.f32 7.0, %v54_v17  ;;  %v185_v34 = vrot.slane %v157_v16, %v807_v24 }
  0x1d   :  { %v104_v63 = vadd.f32 %v103_v60, %v97_v59 }
  0x1e   :  { %404 = vperm.xlu0 %650, %v37_v19   ;;  %584 = vperm.xlu1 %651, %v49_v20   ;;  %v158_v20 = vcombine.high %v136_v13, %v136_v13  ;;  %v193_v36 = vrot.slane %v161_v25, %v807_v24  ;;  %v202_v41 = vmul.f32 %v165_v21, %v55_v0 }
  0x1f   :  { %v111_v4 = vadd.f32 %v110_v1, %v104_v63  ;;  %v203_v42 = vmul.f32 %v169_v30, %v55_v0  ;;  %v206_v44 = vmul.f32 %v181_v32, %v55_v0  ;;  %v207_v46 = vmul.f32 %v185_v34, %v55_v0 }
  0x20   :  { %v173_v31 = vrot.slane %v158_v20, %v807_v24  ;;  %v209_v48 = vmul.f32 %v193_v36, %v55_v0 }
  0x21   :  { %v211_v7 = vcombine.high %v111_v4, %v111_v4  ;;  %v218_v11 = vrot.slane %v111_v4, %v119_v3 }
  0x22   :  { %409 = vperm.xlu0 %650, %v38_v22   ;;  %589 = vperm.xlu1 %651, %v50_v23   ;;  %v159_v22 = vcombine.high %v143_v14, %v143_v14  ;;  %v160_v23 = vcombine.high %v150_v15, %v150_v15  ;;  %v204_v43 = vmul.f32 %v173_v31, %v55_v0 }
  0x23   :  { %v225_v12 = vrot.slane %v211_v7, %v119_v3  ;;  %v226_v18 = vcombine.high %v218_v11, %v218_v11  ;;  %v234_v26 = vrot.slane %v218_v11, %v119_v3 }
  0x24   :  { %v177_v33 = vrot.slane %v160_v23, %v807_v24  ;;  %v189_v35 = vrot.slane %v159_v22, %v807_v24 }
  0x25   :  { %v227_v19 = vcombine.high %v225_v12, %v225_v12  ;;  %v241_v27 = vrot.slane %v225_v12, %v119_v3  ;;  %v248_v28 = vrot.slane %v226_v18, %v119_v3  ;;  %v256_v37 = vcombine.high %v234_v26, %v234_v26 }
  0x26   :  { %v205_v45 = vmul.f32 %v177_v33, %v55_v0  ;;  %v208_v47 = vmul.f32 %v189_v35, %v55_v0  ;;  %v263_v49 = vrot.slane %v234_v26, %v807_v24 }
  0x27   :  { %v255_v29 = vrot.slane %v227_v19, %v119_v3  ;;  %v257_v38 = vcombine.high %v241_v27, %v241_v27  ;;  %v258_v39 = vcombine.high %v248_v28, %v248_v28  ;;  %v267_v50 = vrot.slane %v248_v28, %v807_v24 }
  0x28   :  { %v271_v51 = vrot.slane %v256_v37, %v807_v24  ;;  %v279_v52 = vrot.slane %v241_v27, %v807_v24  ;;  %v300_v58 = vsub.f32 %v202_v41, %v263_v49 }
  0x29   :  { %v259_v40 = vcombine.high %v255_v29, %v255_v29  ;;  %v275_v53 = vrot.slane %v258_v39, %v807_v24  ;;  %v283_v54 = vrot.slane %v255_v29, %v807_v24  ;;  %v287_v55 = vrot.slane %v257_v38, %v807_v24 }
  0x2a   :  { %v301_v59 = vsub.f32 %v203_v42, %v267_v50  ;;  %v302_v60 = vsub.f32 %v204_v43, %v271_v51  ;;  %v304_v61 = vsub.f32 %v206_v44, %v279_v52  ;;  %v309_v3 = vmul.f32 %v308_v57, %v300_v58 }
  0x2b   :  { %v291_v56 = vrot.slane %v259_v40, %v807_v24  ;;  %v303_v62 = vsub.f32 %v205_v45, %v275_v53  ;;  %v305_v63 = vsub.f32 %v207_v46, %v283_v54  ;;  %v306_v1 = vsub.f32 %v208_v47, %v287_v55 }
  0x2c   :  { %v310_v4 = vmul.f32 %v308_v57, %v301_v59  ;;  %v311_v5 = vmul.f32 %v308_v57, %v302_v60  ;;  %v313_v6 = vmul.f32 %v308_v57, %v304_v61  ;;  %v318_v10 = vsel %vm317_vm1, %v309_v3, -inf }
  0x2d   :  { %v307_v2 = vsub.f32 %v209_v48, %v291_v56  ;;  %v312_v7 = vmul.f32 %v308_v57, %v303_v62  ;;  %v314_v8 = vmul.f32 %v308_v57, %v305_v63  ;;  %v315_v24 = vmul.f32 %v308_v57, %v306_v1 }
  0x2e   :  { %v319_v11 = vsel %vm317_vm1, %v310_v4, -inf  ;;  %v320_v12 = vsel %vm317_vm1, %v311_v5, -inf  ;;  %v322_v13 = vsel %vm317_vm1, %v313_v6, -inf }
  0x2f   :  { %v316_v9 = vmul.f32 %v308_v57, %v307_v2  ;;  %v321_v14 = vsel %vm317_vm1, %v312_v7, -inf  ;;  %v324_v15 = vsel %vm317_vm1, %v314_v8, -inf  ;;  %v326_v16 = vsel %vm317_vm1, %v315_v24, -inf }
  0x30   :  { %v323_v18 = vmax.f32 %v318_v10, %v322_v13  ;;  %v325_v19 = vmax.f32 %v319_v11, %v324_v15  ;;  %v327_v20 = vmax.f32 %v320_v12, %v326_v16 }
  0x31   :  { %v328_v17 = vsel %vm317_vm1, %v316_v9, -inf }
  0x32   :  { %v329_v22 = vmax.f32 %v321_v14, %v328_v17  ;;  %v330_v23 = vmax.f32 %v323_v18, %v325_v19 }
  0x34   :  { %v331_v25 = vmax.f32 %v327_v20, %v329_v22 }
  0x36   :  { %v332_v26 = vmax.f32 %v330_v23, %v331_v25 }
  0x38   :  { %v333_v0 = vsub.f32 %v309_v3, %v332_v26  ;;  %v334_v27 = vsub.f32 %v310_v4, %v332_v26  ;;  %v335_v21 = vsub.f32 %v311_v5, %v332_v26  ;;  %v336_v31 = vsub.f32 %v312_v7, %v332_v26 }
  0x39   :  { %v337_v33 = vsub.f32 %v313_v6, %v332_v26  ;;  %v338_v35 = vsub.f32 %v314_v8, %v332_v26  ;;  %v339_v39 = vsub.f32 %v315_v24, %v332_v26  ;;  %v340_v45 = vsub.f32 %v316_v9, %v332_v26 }
  0x3a   :  { %v341_v28 = vmul.f32 1.442695, %v333_v0  ;;  %v343_v29 = vmul.f32 1.442695, %v334_v27  ;;  %v345_v30 = vmul.f32 1.442695, %v335_v21 }
  0x3b   :  { %v347_v32 = vmul.f32 1.442695, %v336_v31  ;;  %v349_v34 = vmul.f32 1.442695, %v337_v33  ;;  %v351_v38 = vmul.f32 1.442695, %v338_v35 }
  0x3c   :  { %653 = vpow2.f32 %v341_v28  ;;  %v353_v44 = vmul.f32 1.442695, %v339_v39  ;;  %v355_v49 = vmul.f32 1.442695, %v340_v45 }
  0x3d   :  { %655 = vpow2.f32 %v343_v29 }
  0x3e   :  { %657 = vpow2.f32 %v345_v30 }
  0x3f   :  { %659 = vpow2.f32 %v347_v32 }
  0x40   :  { %661 = vpow2.f32 %v349_v34 }
  0x41   :  { %663 = vpow2.f32 %v351_v38 }
  0x42   :  { %665 = vpow2.f32 %v353_v44 }
  0x43   :  { %667 = vpow2.f32 %v355_v49 }
  0x46   :  { %v654_v36 = vpop.eup %653 }
  0x47   :  { %v656_v37 = vpop.eup %655  ;;  %v357_v40 = vsel %vm317_vm1, %v654_v36, 0.0 }
  0x48   :  { %v358_v41 = vsel %vm317_vm1, %v656_v37, 0.0  ;;  %v658_v42 = vpop.eup %657 }
  0x49   :  { %v359_v43 = vadd.f32 %v358_v41, %v357_v40  ;;  %v360_v46 = vsel %vm317_vm1, %v658_v42, 0.0  ;;  %v660_v47 = vpop.eup %659 }
  0x4a   :  { %v362_v50 = vsel %vm317_vm1, %v660_v47, 0.0  ;;  %v662_v51 = vpop.eup %661 }
  0x4b   :  { %v361_v48 = vadd.f32 %v360_v46, %v359_v43  ;;  %v364_v54 = vsel %vm317_vm1, %v662_v51, 0.0  ;;  %v664_v55 = vpop.eup %663 }
  0x4c   :  { %v366_v57 = vsel %vm317_vm1, %v664_v55, 0.0  ;;  %v666_v58 = vpop.eup %665 }
  0x4d   :  { %v363_v52 = vadd.f32 %v362_v50, %v361_v48  ;;  %v368_v61 = vsel %vm317_vm1, %v666_v58, 0.0  ;;  %v668_v62 = vpop.eup %667 }
  0x4e   :  { %v370_v2 = vsel %vm317_vm1, %v668_v62, 0.0 }
  0x4f   :  { %v365_v56 = vadd.f32 %v364_v54, %v363_v52 }
  0x51   :  { %v367_v60 = vadd.f32 %v366_v57, %v365_v56 }
  0x53   :  { %v369_v63 = vadd.f32 %v368_v61, %v367_v60 }
  0x55   :  { %v371_v3 = vadd.f32 %v370_v2, %v369_v63 }
  0x57   :  { %669 = vrcp.f32 %v371_v3 }
  0x61   :  { %v670_v13 = vpop.eup %669 }
  0x62   :  { %v436_v19 = vmul.f32 %v670_v13, %v371_v3 }
  0x64   :  { %v437_v26 = vsub.f32 2.0, %v436_v19 }
  0x66   :  { %v438_v21 = vmul.f32 %v670_v13, %v437_v26 }
  0x68   :  { %v439_v35 = vmul.f32 %v438_v21, %v371_v3 }
  0x6a   :  { %v440_v39 = vsub.f32 2.0, %v439_v35 }
  0x85   :  { %v375_v53 = vpop.permute.xlu0 %374  ;;  %v385_v5 = vpop.permute.xlu1 %384 }
  0x86   :  { %v412_v6 = vmul.f32 %v654_v36, %v375_v53  ;;  %v414_v10 = vmul.f32 %v658_v42, %v385_v5  ;;  %v441_v42 = vmul.f32 %v440_v39, %v438_v21 }
  0x88   :  { %v420_v24 = vsel %vm317_vm1, %v412_v6, 0.0  ;;  %v423_v14 = vsel %vm317_vm1, %v414_v10, 0.0 }
  0x89   :  { %v380_v59 = vpop.permute.xlu0 %379  ;;  %v390_v11 = vpop.permute.xlu1 %389 }
  0x8a   :  { %v413_v7 = vmul.f32 %v656_v37, %v380_v59  ;;  %v415_v15 = vmul.f32 %v660_v47, %v390_v11 }
  0x8c   :  { %v421_v9 = vsel %vm317_vm1, %v413_v7, 0.0  ;;  %v425_v20 = vsel %vm317_vm1, %v415_v15, 0.0 }
  0x8d   :  { %v453_v1 = vpop.permute.xlu0 %452  ;;  %v422_v12 = vadd.f32 %v421_v9, %v420_v24  ;;  %v458_v17 = vpop.permute.xlu1 %457 }
  0x8f   :  { %v424_v18 = vadd.f32 %v423_v14, %v422_v12 }
  0x91   :  { %v395_v4 = vpop.permute.xlu0 %394  ;;  %v426_v23 = vadd.f32 %v425_v20, %v424_v18  ;;  %v463_v28 = vpop.permute.xlu1 %462 }
  0x92   :  { %v416_v22 = vmul.f32 %v662_v51, %v395_v4 }
  0x94   :  { %v427_v0 = vsel %vm317_vm1, %v416_v22, 0.0 }
  0x95   :  { %v400_v8 = vpop.permute.xlu0 %399  ;;  %v428_v29 = vadd.f32 %v427_v0, %v426_v23  ;;  %v468_v33 = vpop.permute.xlu1 %467 }
  0x96   :  { %v417_v27 = vmul.f32 %v664_v55, %v400_v8 }
  0x98   :  { %v429_v30 = vsel %vm317_vm1, %v417_v27, 0.0 }
  0x99   :  { %v575_v16 = vpop.permute.xlu0 %574  ;;  %v430_v34 = vadd.f32 %v429_v30, %v428_v29  ;;  %v580_v40 = vpop.permute.xlu1 %579 }
  0x9d   :  { %v405_v25 = vpop.permute.xlu0 %404  ;;  %v585_v44 = vpop.permute.xlu1 %584 }
  0x9e   :  { %v418_v31 = vmul.f32 %v666_v58, %v405_v25 }
  0xa0   :  { %v431_v36 = vsel %vm317_vm1, %v418_v31, 0.0 }
  0xa1   :  { %v410_v32 = vpop.permute.xlu0 %409  ;;  %v432_v38 = vadd.f32 %v431_v36, %v430_v34  ;;  %v590_v63 = vpop.permute.xlu1 %589 }
  0xa2   :  { %v419_v37 = vmul.f32 %v668_v62, %v410_v32 }
  0xa4   :  { %v433_v41 = vsel %vm317_vm1, %v419_v37, 0.0 }
  0xa5   :  { %v434_v43 = vadd.f32 %v433_v41, %v432_v38 }
  0xa7   :  { %v442_v45 = vmul.f32 %v441_v42, %v434_v43 }
  0xa9   :  { %v443_v55 = vsel %vm317_vm1, %v442_v45, 0.0 }
  0xaa   :  { %v444_v62 = vrot.slane %v443_v55, 4 }
  0xac   :  { %v445_v6 = vadd.f32 %v444_v62, %v443_v55 }
  0xae   :  { %v446_v10 = vrot.slane %v445_v6, 2 }
  0xb0   :  { %v447_v12 = vadd.f32 %v446_v10, %v445_v6 }
  0xb2   :  { %v448_v15 = vrot.slane %v447_v12, 1 }
  0xb4   :  { %v449_v19 = vadd.f32 %v448_v15, %v447_v12 }
  0xd8   :  { %v641_v46 = vpop.f32.mrb[0].mxu0  ;;  %v644_v47 = vpop.f32.mrb[0].mxu1 }
  0xd9   :  { %v555_v48 = vadd.f32 %v641_v46, %v458_v17  ;;  %v565_v49 = vadd.f32 %v644_v47, %v468_v33  ;;  %v549_v50 = vpop.f32.mrb[1].mxu0  ;;  %v559_v51 = vpop.f32.mrb[1].mxu1  ;;  %v609_v17 = vstv %s893_s1 }
  0xda   :  { %v550_v52 = vadd.f32 %v549_v50, %v453_v1  ;;  %v560_v53 = vadd.f32 %v559_v51, %v463_v28 }
  0xdb   :  { %v569_v54 = vmax.f32 %v555_v48, 0.0  ;;  %v571_v56 = vmax.f32 %v565_v49, 0.0 }
  0xdc   :  { %v568_v57 = vmax.f32 %v550_v52, 0.0  ;;  %v570_v58 = vmax.f32 %v560_v53, 0.0 }
  0xdd   :  { %v593_v59 = vmul.f32 %v580_v40, %v569_v54  ;;  %v595_v3 = vmul.f32 %v590_v63, %v571_v56 }
  0xde   :  { %v592_v60 = vmul.f32 %v575_v16, %v568_v57  ;;  %v594_v61 = vmul.f32 %v585_v44, %v570_v58 }
  0xdf   :  { %v597_v2 = vsel %vm317_vm1, %v593_v59, 0.0  ;;  %v601_v8 = vsel %vm317_vm1, %v595_v3, 0.0 }
  0xe0   :  { %v596_v4 = vsel %vm317_vm1, %v592_v60, 0.0  ;;  %v599_v1 = vsel %vm317_vm1, %v594_v61, 0.0 }
  0xe1   :  { %v598_v5 = vadd.f32 %v597_v2, %v596_v4 }
  0xe3   :  { %v600_v7 = vadd.f32 %v599_v1, %v598_v5 }
  0xe5   :  { %v602_v24 = vadd.f32 %v601_v8, %v600_v7 }
  0xe7   :  { %v603_v9 = vrot.slane %v602_v24, 4 }
  0xe9   :  { %v604_v11 = vadd.f32 %v603_v9, %v602_v24 }
  0xeb   :  { %v605_v13 = vrot.slane %v604_v11, 2 }
  0xed   :  { %v606_v14 = vadd.f32 %v605_v13, %v604_v11 }
  0xef   :  { %v607_v16 = vrot.slane %v606_v14, 1 }
  0xf1   :  { %v608_v18 = vadd.f32 %v607_v16, %v606_v14 }
  0xf3   :  { %v610_v20 = vadd.f32 %v609_v17, %v608_v18 }
  0xf5   :  { %v611_v22 = vadd.f32 %v610_v20, %v449_v19 }
  0xf7   :  { %613 = vst.msk [vmem:[#allocation4] sm:$0x1] %vm612_vm2, %v611_v22 }
  0xf8   :  { %682 = shalt.err (!%p679_p4)
}
  0xf9   :  { %s683_s1 = scalar_lea.hbm %s899_s7, 16 }
  0xfa   :  { %p684_p5 = scmp.ne.s32.totalorder %s899_s7, %s683_s1  ;;  %p687_p6 = scmp.lt.u32.totalorder %s683_s1, %s899_s7 }
  0xfc   :  { %p689_p7 = pnand %p687_p6, %p684_p5 }
  0xfe   :  { %692 = shalt.err (!%p689_p7)
}
  0xff   :  { %623 = dma.vmem_to_hbm [thread:$0]  %s621_s17, 16, %s899_s7, [#allocation5]  }
 0x100   :  { %693 = dma.done.wait [#allocation5], 16  }
 0x101   :  { %694 = vsyncadd [#allocation5], 4294967280 }
 0x102   :  { %627 = vsyncpa [#allocation5], 1 }

</bundles_post_ra>
